<compile_context>
chip_gen: v7x
topology: tpu7x:2x2x1
jax: 0.10.0
libtpu: 0.0.40
codegen_flags: <defaults>
</compile_context>

<pallas_src>
import jax
import jax.numpy as jnp
from jax.experimental import pallas as pl
from jax.experimental.pallas import tpu as pltpu

IN_FEAT = 3 * 28 * 28      # 2352; used unpadded as the layer-1 K dim (full array dim is legal)
HIDDEN = 100
NUM_CLASS = 10

HID_PAD = 128              # lane-padded hidden width
OUT_PAD = 128              # lane-padded classifier width (>=128 avoids masked vst)
MAX_TB = 512               # max batch tile (sweet spot per review; beyond 512 just spills)


def _mlp_kernel(x_ref,
                w1_ref, b1_ref,
                w2_ref, b2_ref,
                w3_ref, b3_ref,
                w4_ref, b4_ref,
                w5_ref, b5_ref,
                out_ref):
    # x: (TB, 2352) f32 -> cast to bf16 in-kernel (no separate HBM cast pass).
    # W: bf16 (in, out); b: f32 (1, out). f32 accumulation on the MXU.
    def layer(h, w_ref, b_ref):
        y = jnp.dot(h, w_ref[...], preferred_element_type=jnp.float32) + b_ref[...]
        return jnp.maximum(y, 0.0).astype(jnp.bfloat16)   # bf16 between layers

    h = x_ref[...].astype(jnp.bfloat16)
    h = layer(h, w1_ref, b1_ref)
    h = layer(h, w2_ref, b2_ref)
    h = layer(h, w3_ref, b3_ref)
    h = layer(h, w4_ref, b4_ref)
    out_ref[...] = (jnp.dot(h, w5_ref[...], preferred_element_type=jnp.float32)
                    + b5_ref[...])


def _round_up(v, m):
    return -(-v // m) * m


def _choose_batch_tile(B):
    """Static (trace-time) batch tile: multiple of 16 (bf16 packing), minimal batch
    padding, and at least two grid steps once B >= 32 so megacore has work for both
    TensorCores."""
    if B <= 16:
        return 16
    n_steps = -(-B // MAX_TB)          # minimum steps so the tile fits MAX_TB
    if B >= 32:
        n_steps = max(n_steps, 2)      # keep both v7x TensorCores busy
    return _round_up(-(-B // n_steps), 16)


def _supports_pipeline_mode():
    try:
        pl.BlockSpec((16, 128), lambda i: (i, 0), pipeline_mode=pl.Buffered(1))
        return True
    except Exception:
        return False


_HAS_PIPELINE_MODE = _supports_pipeline_mode()


def _pad_to(a, shape):
    return jnp.pad(a, [(0, t - s) for s, t in zip(a.shape, shape)])


def prepare_params(params):
    """One-time layout prep (hoisted out of the forward hot path):
    transpose PyTorch (out, in) weights to (in, out), pad lane dims to 128, cast to bf16."""
    (w1, b1), (w2, b2), (w3, b3), (w4, b4), (w5, b5) = params

    def prep_w(w, in_pad, out_pad):
        return _pad_to(w.T, (in_pad, out_pad)).astype(jnp.bfloat16)

    def prep_b(b, out_pad):
        return _pad_to(b[None, :], (1, out_pad)).astype(jnp.float32)

    return (prep_w(w1, IN_FEAT, HID_PAD), prep_b(b1, HID_PAD),
            prep_w(w2, HID_PAD, HID_PAD), prep_b(b2, HID_PAD),
            prep_w(w3, HID_PAD, HID_PAD), prep_b(b3, HID_PAD),
            prep_w(w4, HID_PAD, HID_PAD), prep_b(b4, HID_PAD),
            prep_w(w5, HID_PAD, OUT_PAD), prep_b(b5, OUT_PAD))


@jax.jit
def mlp_forward(x, prepped_params):
    """x: (B, 3, 28, 28) f32 -> logits (B, NUM_CLASS) f32."""
    B = x.shape[0]
    x2d = x.reshape(B, -1)                         # (B, 2352), same order as torch .view

    tb = _choose_batch_tile(B)
    bp = _round_up(B, tb)
    if bp != B:                                    # static check: pad only a ragged tail
        x2d = jnp.pad(x2d, ((0, bp - B), (0, 0)))
    n_steps = bp // tb

    # x: batch-tiled, f32 (cast happens in-kernel). Deeper buffering only once the grid
    # is long enough to use it (mainly helps HBM-bound v5e).
    if _HAS_PIPELINE_MODE and n_steps >= 3:
        x_spec = pl.BlockSpec((tb, IN_FEAT), lambda i: (i, 0),
                              pipeline_mode=pl.Buffered(3))
    else:
        x_spec = pl.BlockSpec((tb, IN_FEAT), lambda i: (i, 0))

    # Weights/biases: constant index map -> fetched once, VMEM-resident; single-buffered.
    const = lambda i: (0, 0)
    param_shapes = [(IN_FEAT, HID_PAD), (1, HID_PAD),
                    (HID_PAD, HID_PAD), (1, HID_PAD),
                    (HID_PAD, HID_PAD), (1, HID_PAD),
                    (HID_PAD, HID_PAD), (1, HID_PAD),
                    (HID_PAD, OUT_PAD), (1, OUT_PAD)]
    if _HAS_PIPELINE_MODE:
        param_specs = [pl.BlockSpec(s, const, pipeline_mode=pl.Buffered(1))
                       for s in param_shapes]
    else:
        param_specs = [pl.BlockSpec(s, const) for s in param_shapes]

    out_spec = pl.BlockSpec((tb, OUT_PAD), lambda i: (i, 0))

    flops = 2 * bp * (IN_FEAT * HID_PAD + 3 * HID_PAD * HID_PAD + HID_PAD * OUT_PAD)
    weight_bytes = (2 * (IN_FEAT * HID_PAD + 3 * HID_PAD * HID_PAD + HID_PAD * OUT_PAD)
                    + 4 * (4 * HID_PAD + OUT_PAD))
    bytes_accessed = weight_bytes + bp * IN_FEAT * 4 + bp * OUT_PAD * 4
    cost = pl.CostEstimate(flops=flops, transcendentals=0, bytes_accessed=bytes_accessed)

    out_padded = pl.pallas_call(
        _mlp_kernel,
        grid=(n_steps,),
        in_specs=[x_spec] + param_specs,
        out_specs=out_spec,
        out_shape=jax.ShapeDtypeStruct((bp, OUT_PAD), jnp.float32),
        compiler_params=pltpu.CompilerParams(dimension_semantics=("parallel",)),
        cost_estimate=cost,
    )(x2d, *prepped_params)

    return out_padded[:B, :NUM_CLASS]


def init_params(key):
    """Deterministic init matching PyTorch Linear shapes: W (out, in), b (out,)."""
    dims = [(IN_FEAT, HIDDEN), (HIDDEN, HIDDEN), (HIDDEN, HIDDEN),
            (HIDDEN, HIDDEN), (HIDDEN, NUM_CLASS)]
    params = []
    for fan_in, fan_out in dims:
        key, kw, kb = jax.random.split(key, 3)
        bound = 1.0 / jnp.sqrt(fan_in)
        w = jax.random.uniform(kw, (fan_out, fan_in), jnp.float32, -bound, bound)
        b = jax.random.uniform(kb, (fan_out,), jnp.float32, -bound, bound)
        params.append((w, b))
    return params


def reference_forward(x, params):
    h = x.reshape(x.shape[0], -1)
    for i, (w, b) in enumerate(params):
        h = h @ w.T + b
        if i < len(params) - 1:
            h = jnp.maximum(h, 0.0)
    return h


if __name__ == "__main__":
    key = jax.random.PRNGKey(0)
    kx, kp = jax.random.split(key)
    params = init_params(kp)
    prepped = prepare_params(params)

    # small example input consistent with the module
    x = jax.random.normal(kx, (2, 3, 28, 28), jnp.float32)
    out = jax.block_until_ready(mlp_forward(x, prepped))
    ref = reference_forward(x, params)
    assert out.shape == (2, NUM_CLASS)
    err = float(jnp.max(jnp.abs(out - ref)))
    assert err < 5e-2, f"mismatch vs reference (B=2), max abs err = {err}"

    # ragged batch: exercises the tail-padding path
    x2 = jax.random.normal(kx, (13, 3, 28, 28), jnp.float32)
    out2 = jax.block_until_ready(mlp_forward(x2, prepped))
    ref2 = reference_forward(x2, params)
    assert out2.shape == (13, NUM_CLASS)
    err2 = float(jnp.max(jnp.abs(out2 - ref2)))
    assert err2 < 5e-2, f"mismatch vs reference (B=13), max abs err = {err2}"

    # pad-free multi-step grid: exercises the no-pad + megacore (grid=2) path
    x3 = jax.random.normal(kx, (64, 3, 28, 28), jnp.float32)
    out3 = jax.block_until_ready(mlp_forward(x3, prepped))
    ref3 = reference_forward(x3, params)
    assert out3.shape == (64, NUM_CLASS)
    err3 = float(jnp.max(jnp.abs(out3 - ref3)))
    assert err3 < 5e-2, f"mismatch vs reference (B=64), max abs err = {err3}"

    print("KERNEL_OK")
</pallas_src>

<mosaic_0001>
module attributes {stable_mosaic.version = 11 : i64} {
  func.func @_mlp_kernel(%arg0: i32, %arg1: memref<16x2352xf32, #tpu.memory_space<vmem>>, %arg2: memref<2352x128xbf16, #tpu.memory_space<vmem>>, %arg3: memref<1x128xf32, #tpu.memory_space<vmem>>, %arg4: memref<128x128xbf16, #tpu.memory_space<vmem>>, %arg5: memref<1x128xf32, #tpu.memory_space<vmem>>, %arg6: memref<128x128xbf16, #tpu.memory_space<vmem>>, %arg7: memref<1x128xf32, #tpu.memory_space<vmem>>, %arg8: memref<128x128xbf16, #tpu.memory_space<vmem>>, %arg9: memref<1x128xf32, #tpu.memory_space<vmem>>, %arg10: memref<128x128xbf16, #tpu.memory_space<vmem>>, %arg11: memref<1x128xf32, #tpu.memory_space<vmem>>, %arg12: memref<16x128xf32, #tpu.memory_space<vmem>>) attributes {dimension_semantics = [#tpu.dimension_semantics<parallel>], iteration_bounds = array<i64: 1>, scalar_prefetch = 0 : i64, scratch_operands = 0 : i64, tpu.core_type = #tpu.core_type<tc>, window_params = [{transform_indices = @transform_0, window_bounds = array<i64: 16, 2352>}, {pipeline_mode = #tpu.pipeline_mode<synchronous>, transform_indices = @transform_1, window_bounds = array<i64: 2352, 128>}, {pipeline_mode = #tpu.pipeline_mode<synchronous>, transform_indices = @transform_2, window_bounds = array<i64: 1, 128>}, {pipeline_mode = #tpu.pipeline_mode<synchronous>, transform_indices = @transform_3, window_bounds = array<i64: 128, 128>}, {pipeline_mode = #tpu.pipeline_mode<synchronous>, transform_indices = @transform_4, window_bounds = array<i64: 1, 128>}, {pipeline_mode = #tpu.pipeline_mode<synchronous>, transform_indices = @transform_5, window_bounds = array<i64: 128, 128>}, {pipeline_mode = #tpu.pipeline_mode<synchronous>, transform_indices = @transform_6, window_bounds = array<i64: 1, 128>}, {pipeline_mode = #tpu.pipeline_mode<synchronous>, transform_indices = @transform_7, window_bounds = array<i64: 128, 128>}, {pipeline_mode = #tpu.pipeline_mode<synchronous>, transform_indices = @transform_8, window_bounds = array<i64: 1, 128>}, {pipeline_mode = #tpu.pipeline_mode<synchronous>, transform_indices = @transform_9, window_bounds = array<i64: 128, 128>}, {pipeline_mode = #tpu.pipeline_mode<synchronous>, transform_indices = @transform_10, window_bounds = array<i64: 1, 128>}, {transform_indices = @transform_11, window_bounds = array<i64: 16, 128>}]} {
    %c0 = arith.constant 0 : index
    %c0_0 = arith.constant 0 : index
    %0 = vector.load %arg1[%c0, %c0_0] : memref<16x2352xf32, #tpu.memory_space<vmem>>, vector<16x2352xf32>
    %1 = arith.truncf %0 : vector<16x2352xf32> to vector<16x2352xbf16>
    %c0_1 = arith.constant 0 : index
    %c0_2 = arith.constant 0 : index
    %2 = vector.load %arg2[%c0_1, %c0_2] : memref<2352x128xbf16, #tpu.memory_space<vmem>>, vector<2352x128xbf16>
    %cst = arith.constant dense<0.000000e+00> : vector<16x128xf32>
    %3 = tpu.matmul %1, %2, %cst {dimension_numbers = #tpu.dot_dimension_numbers<[1], [0], [0], [1], [0, 0, 1, 1], [], []>} : vector<16x2352xbf16>, vector<2352x128xbf16>, vector<16x128xf32> -> vector<16x128xf32>
    %c0_3 = arith.constant 0 : index
    %c0_4 = arith.constant 0 : index
    %4 = vector.load %arg3[%c0_3, %c0_4] : memref<1x128xf32, #tpu.memory_space<vmem>>, vector<1x128xf32>
    %5 = vector.broadcast %4 : vector<1x128xf32> to vector<16x128xf32>
    %6 = arith.addf %3, %5 : vector<16x128xf32>
    %cst_5 = arith.constant 0.000000e+00 : f32
    %7 = vector.broadcast %cst_5 : f32 to vector<16x128xf32>
    %8 = arith.maximumf %6, %7 : vector<16x128xf32>
    %9 = arith.truncf %8 : vector<16x128xf32> to vector<16x128xbf16>
    %c0_6 = arith.constant 0 : index
    %c0_7 = arith.constant 0 : index
    %10 = vector.load %arg4[%c0_6, %c0_7] : memref<128x128xbf16, #tpu.memory_space<vmem>>, vector<128x128xbf16>
    %cst_8 = arith.constant dense<0.000000e+00> : vector<16x128xf32>
    %11 = tpu.matmul %9, %10, %cst_8 {dimension_numbers = #tpu.dot_dimension_numbers<[1], [0], [0], [1], [0, 0, 1, 1], [], []>} : vector<16x128xbf16>, vector<128x128xbf16>, vector<16x128xf32> -> vector<16x128xf32>
    %c0_9 = arith.constant 0 : index
    %c0_10 = arith.constant 0 : index
    %12 = vector.load %arg5[%c0_9, %c0_10] : memref<1x128xf32, #tpu.memory_space<vmem>>, vector<1x128xf32>
    %13 = vector.broadcast %12 : vector<1x128xf32> to vector<16x128xf32>
    %14 = arith.addf %11, %13 : vector<16x128xf32>
    %cst_11 = arith.constant 0.000000e+00 : f32
    %15 = vector.broadcast %cst_11 : f32 to vector<16x128xf32>
    %16 = arith.maximumf %14, %15 : vector<16x128xf32>
    %17 = arith.truncf %16 : vector<16x128xf32> to vector<16x128xbf16>
    %c0_12 = arith.constant 0 : index
    %c0_13 = arith.constant 0 : index
    %18 = vector.load %arg6[%c0_12, %c0_13] : memref<128x128xbf16, #tpu.memory_space<vmem>>, vector<128x128xbf16>
    %cst_14 = arith.constant dense<0.000000e+00> : vector<16x128xf32>
    %19 = tpu.matmul %17, %18, %cst_14 {dimension_numbers = #tpu.dot_dimension_numbers<[1], [0], [0], [1], [0, 0, 1, 1], [], []>} : vector<16x128xbf16>, vector<128x128xbf16>, vector<16x128xf32> -> vector<16x128xf32>
    %c0_15 = arith.constant 0 : index
    %c0_16 = arith.constant 0 : index
    %20 = vector.load %arg7[%c0_15, %c0_16] : memref<1x128xf32, #tpu.memory_space<vmem>>, vector<1x128xf32>
    %21 = vector.broadcast %20 : vector<1x128xf32> to vector<16x128xf32>
    %22 = arith.addf %19, %21 : vector<16x128xf32>
    %cst_17 = arith.constant 0.000000e+00 : f32
    %23 = vector.broadcast %cst_17 : f32 to vector<16x128xf32>
    %24 = arith.maximumf %22, %23 : vector<16x128xf32>
    %25 = arith.truncf %24 : vector<16x128xf32> to vector<16x128xbf16>
    %c0_18 = arith.constant 0 : index
    %c0_19 = arith.constant 0 : index
    %26 = vector.load %arg8[%c0_18, %c0_19] : memref<128x128xbf16, #tpu.memory_space<vmem>>, vector<128x128xbf16>
    %cst_20 = arith.constant dense<0.000000e+00> : vector<16x128xf32>
    %27 = tpu.matmul %25, %26, %cst_20 {dimension_numbers = #tpu.dot_dimension_numbers<[1], [0], [0], [1], [0, 0, 1, 1], [], []>} : vector<16x128xbf16>, vector<128x128xbf16>, vector<16x128xf32> -> vector<16x128xf32>
    %c0_21 = arith.constant 0 : index
    %c0_22 = arith.constant 0 : index
    %28 = vector.load %arg9[%c0_21, %c0_22] : memref<1x128xf32, #tpu.memory_space<vmem>>, vector<1x128xf32>
    %29 = vector.broadcast %28 : vector<1x128xf32> to vector<16x128xf32>
    %30 = arith.addf %27, %29 : vector<16x128xf32>
    %cst_23 = arith.constant 0.000000e+00 : f32
    %31 = vector.broadcast %cst_23 : f32 to vector<16x128xf32>
    %32 = arith.maximumf %30, %31 : vector<16x128xf32>
    %33 = arith.truncf %32 : vector<16x128xf32> to vector<16x128xbf16>
    %c0_24 = arith.constant 0 : index
    %c0_25 = arith.constant 0 : index
    %34 = vector.load %arg10[%c0_24, %c0_25] : memref<128x128xbf16, #tpu.memory_space<vmem>>, vector<128x128xbf16>
    %cst_26 = arith.constant dense<0.000000e+00> : vector<16x128xf32>
    %35 = tpu.matmul %33, %34, %cst_26 {dimension_numbers = #tpu.dot_dimension_numbers<[1], [0], [0], [1], [0, 0, 1, 1], [], []>} : vector<16x128xbf16>, vector<128x128xbf16>, vector<16x128xf32> -> vector<16x128xf32>
    %c0_27 = arith.constant 0 : index
    %c0_28 = arith.constant 0 : index
    %36 = vector.load %arg11[%c0_27, %c0_28] : memref<1x128xf32, #tpu.memory_space<vmem>>, vector<1x128xf32>
    %37 = vector.broadcast %36 : vector<1x128xf32> to vector<16x128xf32>
    %38 = arith.addf %35, %37 : vector<16x128xf32>
    %c0_29 = arith.constant 0 : index
    %c0_30 = arith.constant 0 : index
    %39 = vector.load %arg12[%c0_29, %c0_30] : memref<16x128xf32, #tpu.memory_space<vmem>>, vector<16x128xf32>
    tpu.vector_store %arg12[%c0_29, %c0_30], %38 {strides = array<i32>} : memref<16x128xf32, #tpu.memory_space<vmem>>, vector<16x128xf32>,
    return
  }
  func.func @transform_0(%arg0: i32) -> (i32, i32) {
    %c0_i32 = arith.constant 0 : i32
    %c0_i32_0 = arith.constant 0 : i32
    return %arg0, %c0_i32 : i32, i32
  }
  func.func @transform_1(%arg0: i32) -> (i32, i32) {
    %c0_i32 = arith.constant 0 : i32
    %c0_i32_0 = arith.constant 0 : i32
    %c0_i32_1 = arith.constant 0 : i32
    return %c0_i32, %c0_i32_0 : i32, i32
  }
  func.func @transform_2(%arg0: i32) -> (i32, i32) {
    %c0_i32 = arith.constant 0 : i32
    %c0_i32_0 = arith.constant 0 : i32
    %c0_i32_1 = arith.constant 0 : i32
    return %c0_i32, %c0_i32_0 : i32, i32
  }
  func.func @transform_3(%arg0: i32) -> (i32, i32) {
    %c0_i32 = arith.constant 0 : i32
    %c0_i32_0 = arith.constant 0 : i32
    %c0_i32_1 = arith.constant 0 : i32
    return %c0_i32, %c0_i32_0 : i32, i32
  }
  func.func @transform_4(%arg0: i32) -> (i32, i32) {
    %c0_i32 = arith.constant 0 : i32
    %c0_i32_0 = arith.constant 0 : i32
    %c0_i32_1 = arith.constant 0 : i32
    return %c0_i32, %c0_i32_0 : i32, i32
  }
  func.func @transform_5(%arg0: i32) -> (i32, i32) {
    %c0_i32 = arith.constant 0 : i32
    %c0_i32_0 = arith.constant 0 : i32
    %c0_i32_1 = arith.constant 0 : i32
    return %c0_i32, %c0_i32_0 : i32, i32
  }
  func.func @transform_6(%arg0: i32) -> (i32, i32) {
    %c0_i32 = arith.constant 0 : i32
    %c0_i32_0 = arith.constant 0 : i32
    %c0_i32_1 = arith.constant 0 : i32
    return %c0_i32, %c0_i32_0 : i32, i32
  }
  func.func @transform_7(%arg0: i32) -> (i32, i32) {
    %c0_i32 = arith.constant 0 : i32
    %c0_i32_0 = arith.constant 0 : i32
    %c0_i32_1 = arith.constant 0 : i32
    return %c0_i32, %c0_i32_0 : i32, i32
  }
  func.func @transform_8(%arg0: i32) -> (i32, i32) {
    %c0_i32 = arith.constant 0 : i32
    %c0_i32_0 = arith.constant 0 : i32
    %c0_i32_1 = arith.constant 0 : i32
    return %c0_i32, %c0_i32_0 : i32, i32
  }
  func.func @transform_9(%arg0: i32) -> (i32, i32) {
    %c0_i32 = arith.constant 0 : i32
    %c0_i32_0 = arith.constant 0 : i32
    %c0_i32_1 = arith.constant 0 : i32
    return %c0_i32, %c0_i32_0 : i32, i32
  }
  func.func @transform_10(%arg0: i32) -> (i32, i32) {
    %c0_i32 = arith.constant 0 : i32
    %c0_i32_0 = arith.constant 0 : i32
    %c0_i32_1 = arith.constant 0 : i32
    return %c0_i32, %c0_i32_0 : i32, i32
  }
  func.func @transform_11(%arg0: i32) -> (i32, i32) {
    %c0_i32 = arith.constant 0 : i32
    %c0_i32_0 = arith.constant 0 : i32
    return %arg0, %c0_i32 : i32, i32
  }
}

</mosaic_0001>

<bundles_post_ra>
// kernel: mlp_forward.1
= control target key start
LH: loop header
LB: loop body
LE: loop exit
PB: predicated region body
PF: predicated region fallthrough
CT: control target
= control target key end

     0   :  { %16 = vsyncpa [#allocation3], 0  ;;  %s2895_s17 = smov [#allocation2]   ;;  %s3248_s0 = inlined_call_operand.vmem [shape: f32[16,2352], index: 0, kind: input, shape index: {}]   ;;  %s3249_s1 = inlined_call_operand.hbm [shape: bf16[2352,128], index: 1, kind: input, shape index: {}]   ;;  %s3250_s2 = inlined_call_operand.vmem [shape: f32[1,128], index: 2, kind: input, shape index: {}]   ;;  %s3251_s3 = inlined_call_operand.vmem [shape: bf16[128,128], index: 3, kind: input, shape index: {}]   ;;  %s3252_s4 = inlined_call_operand.vmem [shape: f32[1,128], index: 4, kind: input, shape index: {}]   ;;  %s3253_s5 = inlined_call_operand.vmem [shape: bf16[128,128], index: 5, kind: input, shape index: {}]   ;;  %s3254_s6 = inlined_call_operand.vmem [shape: f32[1,128], index: 6, kind: input, shape index: {}]   ;;  %s3255_s7 = inlined_call_operand.vmem [shape: bf16[128,128], index: 7, kind: input, shape index: {}]   ;;  %s3256_s8 = inlined_call_operand.vmem [shape: f32[1,128], index: 8, kind: input, shape index: {}]   ;;  %s3257_s9 = inlined_call_operand.vmem [shape: bf16[128,128], index: 9, kind: input, shape index: {}]   ;;  %s3258_s10 = inlined_call_operand.vmem [shape: f32[1,128], index: 10, kind: input, shape index: {}]   ;;  %s3259_s11 = inlined_call_operand.vmem [shape: f32[16,128], index: 11, kind: output, shape index: {}]  }
   0x1   :  { %s24_s18 = sshll.u32 %s2895_s17, 4  ;;  %s2871_s21 = scalar_lea.hbm %s3249_s1, 18816  ;;  %s25_s18 = int_to_ptr.vmem [resolvable:$true] %s24_s18 }
   0x2   :  { %p2872_p0 = scmp.ne.s32.totalorder %s3249_s1, %s2871_s21  ;;  %p2875_p1 = scmp.lt.u32.totalorder %s2871_s21, %s3249_s1 }
   0x4   :  { %p2877_p2 = pnand %p2875_p1, %p2872_p0 }
   0x6   :  { %2880 = shalt.err (!%p2877_p2)
}
   0x7   :  { %s2881_s26 = scalar_lea.vmem %s25_s18, 18816  ;;  %p2886_p4 = scmp.lt.s32.totalorder %s25_s18, %s25_s18 }
   0x8   :  { %p2882_p3 = scmp.ne.s32.totalorder %s25_s18, %s2881_s26  ;;  %p2887_p5 = scmp.lt.s32.totalorder %s2881_s26, %s2881_s26 }
   0xa   :  { %p2888_p6 = por %p2887_p5, %p2886_p4 }
   0xc   :  { %p2889_p7 = pnand %p2888_p6, %p2882_p3 }
   0xe   :  { %2892 = shalt.err (!%p2889_p7)
}
   0xf   :  { %s2896_s27 = smov 64   ;;  %s2897_s28 = smov 4  }
  0x10   :  { %30 = dma.hbm_to_vmem [thread:$0]  %s3249_s1, 18816, %s25_s18, [#allocation3], %s2896_s27, %s2896_s27, %s2897_s28  }
  0x11   :  { %2893 = dma.done.wait [#allocation3], 18816  }
  0x12   :  { %2894 = vsyncadd [#allocation3], 4294948480  ;;  %v2692_v0 = vld [vmem:[#allocation2 + $0x40] sm:$0xff]   ;;  %v2696_v4 = vld [vmem:[#allocation2 + $0x48] sm:$0xff]   ;;  %vm2899_vm0 = vmmov 0   ;;  %vm1293_vm1 = vcmask 392192  }
  0x13   :  { %v2693_v1 = vld [vmem:[#allocation2] sm:$0xff]   ;;  %2359 = vmatprep.subr.bf16.mxu0 %v2692_v0  ;;  %v2697_v5 = vld [vmem:[#allocation2 + $0x8] sm:$0xff]   ;;  %v2700_v8 = vld [vmem:[#allocation2 + $0x50] sm:$0xff]  }
  0x14   :  { %v2694_v2 = vld [vmem:[#allocation2 + $0xc0] sm:$0xff]   ;;  %2360 = vmatpush3.bf16.msra.mxu0 %v2693_v1  ;;  %v2698_v6 = vld [vmem:[#allocation2 + $0xc8] sm:$0xff]   ;;  %v2701_v9 = vld [vmem:[#allocation2 + $0x10] sm:$0xff]  }
  0x15   :  { %v2695_v3 = vld [vmem:[#allocation2 + $0x80] sm:$0xff]   ;;  %2381 = vmatprep.subr.bf16.mxu1 %v2694_v2  ;;  %2361 = vmatprep.subr.bf16.mxu0 %v2696_v4  ;;  %v2699_v7 = vld [vmem:[#allocation2 + $0x88] sm:$0xff]   ;;  %v2702_v10 = vld [vmem:[#allocation2 + $0xd0] sm:$0xff]  }
  0x16   :  { %2382 = vmatpush3.bf16.msra.mxu1 %v2695_v3  ;;  %v2703_v11 = vld [vmem:[#allocation2 + $0x90] sm:$0xff]   ;;  %v2704_v12 = vld [vmem:[#allocation2 + $0x58] sm:$0xff]   ;;  %v2708_v16 = vld [vmem:[#allocation2 + $0x60] sm:$0xff]  }
  0x17   :  { %2383 = vmatprep.subr.bf16.mxu1 %v2698_v6  ;;  %v2705_v13 = vld [vmem:[#allocation2 + $0x18] sm:$0xff]   ;;  %v2709_v17 = vld [vmem:[#allocation2 + $0x20] sm:$0xff]   ;;  %v2712_v20 = vld [vmem:[#allocation2 + $0x68] sm:$0xff]  }
  0x18   :  { %2362 = vmatpush3.bf16.msra.mxu0 %v2697_v5  ;;  %v2706_v14 = vld [vmem:[#allocation2 + $0xd8] sm:$0xff]   ;;  %v2710_v18 = vld [vmem:[#allocation2 + $0xe0] sm:$0xff]   ;;  %v2713_v21 = vld [vmem:[#allocation2 + $0x28] sm:$0xff]  }
  0x19   :  { %2363 = vmatprep.subr.bf16.mxu0 %v2700_v8  ;;  %v2707_v15 = vld [vmem:[#allocation2 + $0x98] sm:$0xff]   ;;  %v2711_v19 = vld [vmem:[#allocation2 + $0xa0] sm:$0xff]   ;;  %v2714_v22 = vld [vmem:[#allocation2 + $0xe8] sm:$0xff]  }
  0x1a   :  { %2384 = vmatpush3.bf16.msra.mxu1 %v2699_v7  ;;  %v2715_v23 = vld [vmem:[#allocation2 + $0xa8] sm:$0xff]   ;;  %v2716_v24 = vld [vmem:[#allocation2 + $0x70] sm:$0xff]   ;;  %v2720_v28 = vld [vmem:[#allocation2 + $0x78] sm:$0xff]  }
  0x1b   :  { %2385 = vmatprep.subr.bf16.mxu1 %v2702_v10  ;;  %v2717_v25 = vld [vmem:[#allocation2 + $0x30] sm:$0xff]   ;;  %v2721_v29 = vld [vmem:[#allocation2 + $0x38] sm:$0xff]   ;;  %v54_v31 = vld [vmem:[%s3248_s0 + $0x8] sm:$0xff] }
  0x1c   :  { %2364 = vmatpush3.bf16.msra.mxu0 %v2701_v9  ;;  %v2718_v26 = vld [vmem:[#allocation2 + $0xf0] sm:$0xff]   ;;  %v2722_v30 = vld [vmem:[#allocation2 + $0xf8] sm:$0xff]   ;;  %v73_v32 = vld [vmem:[%s3248_s0 + $0xa0] sm:$0xff] }
  0x1d   :  { %2365 = vmatprep.subr.bf16.mxu0 %v2704_v12  ;;  %v2719_v27 = vld [vmem:[#allocation2 + $0xb0] sm:$0xff]   ;;  %v92_v33 = vpack.c.bf16 %v73_v32, %v54_v31  ;;  %v2723_v34 = vld [vmem:[#allocation2 + $0xb8] sm:$0xff]   ;;  %v53_v35 = vld [vmem:[%s3248_s0] sm:$0xff] }
  0x1e   :  { %2386 = vmatpush3.bf16.msra.mxu1 %v2703_v11  ;;  %v72_v36 = vld [vmem:[%s3248_s0 + $0x98] sm:$0xff]  ;;  %v2724_v38 = vld [vmem:[#allocation2 + $0x140] sm:$0xff]   ;;  %v75_v40 = vld [vmem:[%s3248_s0 + $0xb0] sm:$0xff] }
  0x1f   :  { %2387 = vmatprep.subr.bf16.mxu1 %v2706_v14  ;;  %1329 = vmatprep.mubr.bf16.mxu0 %v92_v33  ;;  %v91_v37 = vpack.c.bf16 %v72_v36, %v53_v35  ;;  %v56_v39 = vld [vmem:[%s3248_s0 + $0x18] sm:$0xff]  ;;  %v2725_v42 = vld [vmem:[#allocation2 + $0x100] sm:$0xff]   ;;  %v55_v43 = vld [vmem:[%s3248_s0 + $0x10] sm:$0xff] }
  0x20   :  { %2366 = vmatpush3.bf16.msra.mxu0 %v2705_v13  ;;  %v94_v41 = vpack.c.bf16 %v75_v40, %v56_v39  ;;  %v74_v44 = vld [vmem:[%s3248_s0 + $0xa8] sm:$0xff]  ;;  %v2726_v46 = vld [vmem:[#allocation2 + $0x1c0] sm:$0xff]   ;;  %v2732_v52 = vld [vmem:[#allocation2 + $0x150] sm:$0xff]  }
  0x21   :  { %2367 = vmatprep.subr.bf16.mxu0 %v2708_v16  ;;  %v93_v45 = vpack.c.bf16 %v74_v44, %v55_v43  ;;  %v2727_v47 = vld [vmem:[#allocation2 + $0x180] sm:$0xff]   ;;  %v2728_v48 = vld [vmem:[#allocation2 + $0x148] sm:$0xff]   ;;  %v2733_v53 = vld [vmem:[#allocation2 + $0x110] sm:$0xff]  }
  0x22   :  { %2388 = vmatpush3.bf16.msra.mxu1 %v2707_v15  ;;  %1370 = vmatprep.mubr.bf16.mxu1 %v94_v41  ;;  %v2729_v49 = vld [vmem:[#allocation2 + $0x108] sm:$0xff]   ;;  %v2734_v54 = vld [vmem:[#allocation2 + $0x1d0] sm:$0xff]   ;;  %v2736_v56 = vld [vmem:[#allocation2 + $0x158] sm:$0xff]  }
  0x23   :  { %2389 = vmatprep.subr.bf16.mxu1 %v2710_v18  ;;  %v2730_v50 = vld [vmem:[#allocation2 + $0x1c8] sm:$0xff]   ;;  %v2735_v55 = vld [vmem:[#allocation2 + $0x190] sm:$0xff]   ;;  %v2737_v57 = vld [vmem:[#allocation2 + $0x118] sm:$0xff]  }
  0x24   :  { %2368 = vmatpush3.bf16.msra.mxu0 %v2709_v17  ;;  %v2731_v51 = vld [vmem:[#allocation2 + $0x188] sm:$0xff]   ;;  %v2738_v58 = vld [vmem:[#allocation2 + $0x1d8] sm:$0xff]   ;;  %v2740_v60 = vld [vmem:[#allocation2 + $0x160] sm:$0xff]  }
  0x25   :  { %2369 = vmatprep.subr.bf16.mxu0 %v2712_v20  ;;  %v2739_v59 = vld [vmem:[#allocation2 + $0x198] sm:$0xff]   ;;  %v2741_v61 = vld [vmem:[#allocation2 + $0x120] sm:$0xff]   ;;  %v2744_v0 = vld [vmem:[#allocation2 + $0x168] sm:$0xff]  }
  0x26   :  { %2390 = vmatpush3.bf16.msra.mxu1 %v2711_v19  ;;  %v2742_v62 = vld [vmem:[#allocation2 + $0x1e0] sm:$0xff]   ;;  %v2745_v1 = vld [vmem:[#allocation2 + $0x128] sm:$0xff]   ;;  %v2748_v4 = vld [vmem:[#allocation2 + $0x170] sm:$0xff]  }
  0x27   :  { %2391 = vmatprep.subr.bf16.mxu1 %v2714_v22  ;;  %v2743_v63 = vld [vmem:[#allocation2 + $0x1a0] sm:$0xff]   ;;  %v2746_v2 = vld [vmem:[#allocation2 + $0x1e8] sm:$0xff]   ;;  %v2749_v5 = vld [vmem:[#allocation2 + $0x130] sm:$0xff]  }
  0x28   :  { %2370 = vmatpush3.bf16.msra.mxu0 %v2713_v21  ;;  %v2747_v3 = vld [vmem:[#allocation2 + $0x1a8] sm:$0xff]   ;;  %v2750_v6 = vld [vmem:[#allocation2 + $0x1f0] sm:$0xff]   ;;  %v2752_v8 = vld [vmem:[#allocation2 + $0x178] sm:$0xff]  }
  0x29   :  { %2371 = vmatprep.subr.bf16.mxu0 %v2716_v24  ;;  %v2751_v7 = vld [vmem:[#allocation2 + $0x1b0] sm:$0xff]   ;;  %v2753_v9 = vld [vmem:[#allocation2 + $0x138] sm:$0xff]   ;;  %v58_v11 = vld [vmem:[%s3248_s0 + $0x28] sm:$0xff] }
  0x2a   :  { %2392 = vmatpush3.bf16.msra.mxu1 %v2715_v23  ;;  %v2754_v10 = vld [vmem:[#allocation2 + $0x1f8] sm:$0xff]   ;;  %v77_v12 = vld [vmem:[%s3248_s0 + $0xc0] sm:$0xff]  ;;  %v79_v20 = vld [vmem:[%s3248_s0 + $0xd0] sm:$0xff] }
  0x2b   :  { %2393 = vmatprep.subr.bf16.mxu1 %v2718_v26  ;;  %v96_v13 = vpack.c.bf16 %v77_v12, %v58_v11  ;;  %v2755_v14 = vld [vmem:[#allocation2 + $0x1b8] sm:$0xff]   ;;  %v57_v15 = vld [vmem:[%s3248_s0 + $0x20] sm:$0xff]  ;;  %v59_v23 = vld [vmem:[%s3248_s0 + $0x30] sm:$0xff] }
  0x2c   :  { %2372 = vmatpush3.bf16.msra.mxu0 %v2717_v25  ;;  %v76_v16 = vld [vmem:[%s3248_s0 + $0xb8] sm:$0xff]  ;;  %v2756_v18 = vld [vmem:[#allocation2 + $0x240] sm:$0xff]   ;;  %v78_v24 = vld [vmem:[%s3248_s0 + $0xc8] sm:$0xff] }
  0x2d   :  { %2373 = vmatprep.subr.bf16.mxu0 %v2720_v28  ;;  %v95_v17 = vpack.c.bf16 %v76_v16, %v57_v15  ;;  %v60_v19 = vld [vmem:[%s3248_s0 + $0x38] sm:$0xff]  ;;  %v2757_v22 = vld [vmem:[#allocation2 + $0x200] sm:$0xff]   ;;  %v97_v25 = vpack.c.bf16 %v78_v24, %v59_v23  ;;  %v2760_v28 = vld [vmem:[#allocation2 + $0x248] sm:$0xff]  }
  0x2e   :  { %2394 = vmatpush3.bf16.msra.mxu1 %v2719_v27  ;;  %v98_v21 = vpack.c.bf16 %v79_v20, %v60_v19  ;;  %v2758_v26 = vld [vmem:[#allocation2 + $0x2c0] sm:$0xff]   ;;  %v2763_v31 = vld [vmem:[#allocation2 + $0x288] sm:$0xff]   ;;  %v2764_v32 = vld [vmem:[#allocation2 + $0x250] sm:$0xff]  }
  0x2f   :  { %2395 = vmatprep.subr.bf16.mxu1 %v2722_v30  ;;  %v2759_v27 = vld [vmem:[#allocation2 + $0x280] sm:$0xff]   ;;  %v2762_v30 = vld [vmem:[#allocation2 + $0x2c8] sm:$0xff]   ;;  %v2765_v33 = vld [vmem:[#allocation2 + $0x210] sm:$0xff]  }
  0x30   :  { %2374 = vmatpush3.bf16.msra.mxu0 %v2721_v29  ;;  %v2761_v29 = vld [vmem:[#allocation2 + $0x208] sm:$0xff]   ;;  %v2767_v35 = vld [vmem:[#allocation2 + $0x290] sm:$0xff]   ;;  %v2768_v36 = vld [vmem:[#allocation2 + $0x258] sm:$0xff]  }
  0x31   :  { %2403 = vmatprep.subr.bf16.mxu0 %v2724_v38  ;;  %v2770_v38 = vld [vmem:[#allocation2 + $0x2d8] sm:$0xff]   ;;  %v2772_v40 = vld [vmem:[#allocation2 + $0x260] sm:$0xff]   ;;  %v2776_v44 = vld [vmem:[#allocation2 + $0x268] sm:$0xff]  }
  0x32   :  { %2396 = vmatpush3.bf16.msra.mxu1 %v2723_v34  ;;  %v2766_v34 = vld [vmem:[#allocation2 + $0x2d0] sm:$0xff]   ;;  %v2771_v39 = vld [vmem:[#allocation2 + $0x298] sm:$0xff]   ;;  %v2773_v41 = vld [vmem:[#allocation2 + $0x220] sm:$0xff]  }
  0x33   :  { %1330 = vmatmul.mubr.bf16.vlgmr.msra.gmra.mrb[0].mxu0 %v91_v37  ;;  %2425 = vmatprep.subr.bf16.mxu1 %v2726_v46  ;;  %v2769_v37 = vld [vmem:[#allocation2 + $0x218] sm:$0xff]   ;;  %v2775_v43 = vld [vmem:[#allocation2 + $0x2a0] sm:$0xff]   ;;  %v2778_v46 = vld [vmem:[#allocation2 + $0x2e8] sm:$0xff]  }
  0x34   :  { %2404 = vmatpush3.bf16.msra.mxu0 %v2725_v42  ;;  %1411 = vmatprep.mubr.bf16.mxu0 %v96_v13  ;;  %v2774_v42 = vld [vmem:[#allocation2 + $0x2e0] sm:$0xff]   ;;  %v2795_v11 = vld [vmem:[#allocation2 + $0x388] sm:$0xff]   ;;  %v2796_v12 = vld [vmem:[#allocation2 + $0x350] sm:$0xff]  }
  0x35   :  { %1371 = vmatmul.mubr.bf16.vlgmr.msra.gmra.mrb[0].mxu1 %v93_v45  ;;  %2405 = vmatprep.subr.bf16.mxu0 %v2728_v48  ;;  %v2777_v45 = vld [vmem:[#allocation2 + $0x228] sm:$0xff]   ;;  %v2780_v48 = vld [vmem:[#allocation2 + $0x270] sm:$0xff]   ;;  %v2800_v16 = vld [vmem:[#allocation2 + $0x358] sm:$0xff]  }
  0x36   :  { %2426 = vmatpush3.bf16.msra.mxu1 %v2727_v47  ;;  %1452 = vmatprep.mubr.bf16.mxu1 %v98_v21  ;;  %v2779_v47 = vld [vmem:[#allocation2 + $0x2a8] sm:$0xff]   ;;  %v2797_v13 = vld [vmem:[#allocation2 + $0x310] sm:$0xff]   ;;  %v2803_v19 = vld [vmem:[#allocation2 + $0x398] sm:$0xff]  }
  0x37   :  { %2427 = vmatprep.subr.bf16.mxu1 %v2730_v50  ;;  %v2782_v50 = vld [vmem:[#allocation2 + $0x2f0] sm:$0xff]   ;;  %v2804_v20 = vld [vmem:[#allocation2 + $0x360] sm:$0xff]   ;;  %v2808_v24 = vld [vmem:[#allocation2 + $0x368] sm:$0xff]  }
  0x38   :  { %2406 = vmatpush3.bf16.msra.mxu0 %v2729_v49  ;;  %v2781_v49 = vld [vmem:[#allocation2 + $0x230] sm:$0xff]   ;;  %v2805_v21 = vld [vmem:[#allocation2 + $0x320] sm:$0xff]  }
  0x39   :  { %2407 = vmatprep.subr.bf16.mxu0 %v2732_v52  ;;  %v2784_v52 = vld [vmem:[#allocation2 + $0x278] sm:$0xff]   ;;  %v2799_v15 = vld [vmem:[#allocation2 + $0x390] sm:$0xff]   ;;  %v2807_v23 = vld [vmem:[#allocation2 + $0x3a0] sm:$0xff]  }
  0x3a   :  { %2428 = vmatpush3.bf16.msra.mxu1 %v2731_v51  ;;  %v2783_v51 = vld [vmem:[#allocation2 + $0x2b0] sm:$0xff]  }
  0x3b   :  { %2429 = vmatprep.subr.bf16.mxu1 %v2734_v54  ;;  %v2786_v54 = vld [vmem:[#allocation2 + $0x2f8] sm:$0xff]  }
  0x3c   :  { %2408 = vmatpush3.bf16.msra.mxu0 %v2733_v53  ;;  %v2785_v53 = vld [vmem:[#allocation2 + $0x238] sm:$0xff]  }
  0x3d   :  { %2409 = vmatprep.subr.bf16.mxu0 %v2736_v56  ;;  %v81_v56 = vld [vmem:[%s3248_s0 + $0xe0] sm:$0xff] }
  0x3e   :  { %2430 = vmatpush3.bf16.msra.mxu1 %v2735_v55  ;;  %v62_v55 = vld [vmem:[%s3248_s0 + $0x48] sm:$0xff] }
  0x3f   :  { %2431 = vmatprep.subr.bf16.mxu1 %v2738_v58  ;;  %v2787_v58 = vld [vmem:[#allocation2 + $0x2b8] sm:$0xff]  }
  0x40   :  { %2410 = vmatpush3.bf16.msra.mxu0 %v2737_v57  ;;  %v100_v57 = vpack.c.bf16 %v81_v56, %v62_v55  ;;  %v2826_v55 = vld [vmem:[#allocation2 + $0x458] sm:$0xff]  }
  0x41   :  { %2411 = vmatprep.subr.bf16.mxu0 %v2740_v60  ;;  %v80_v60 = vld [vmem:[%s3248_s0 + $0xd8] sm:$0xff] }
  0x42   :  { %2432 = vmatpush3.bf16.msra.mxu1 %v2739_v59  ;;  %v61_v59 = vld [vmem:[%s3248_s0 + $0x40] sm:$0xff]  ;;  %v2827_v56 = vld [vmem:[#allocation2 + $0x418] sm:$0xff]  }
  0x43   :  { %2433 = vmatprep.subr.bf16.mxu1 %v2742_v62  ;;  %v2788_v62 = vld [vmem:[#allocation2 + $0x340] sm:$0xff]  }
  0x44   :  { %2412 = vmatpush3.bf16.msra.mxu0 %v2741_v61  ;;  %v99_v61 = vpack.c.bf16 %v80_v60, %v61_v59  ;;  %v2829_v59 = vld [vmem:[#allocation2 + $0x420] sm:$0xff]   ;;  %v2830_v60 = vld [vmem:[#allocation2 + $0x468] sm:$0xff]  }
  0x45   :  { %2413 = vmatprep.subr.bf16.mxu0 %v2744_v0  ;;  %v83_v0 = vld [vmem:[%s3248_s0 + $0xf0] sm:$0xff] }
  0x46   :  { %2434 = vmatpush3.bf16.msra.mxu1 %v2743_v63  ;;  %v64_v63 = vld [vmem:[%s3248_s0 + $0x58] sm:$0xff] }
  0x47   :  { %2435 = vmatprep.subr.bf16.mxu1 %v2746_v2  ;;  %v2789_v2 = vld [vmem:[#allocation2 + $0x300] sm:$0xff]  }
  0x48   :  { %2414 = vmatpush3.bf16.msra.mxu0 %v2745_v1  ;;  %v102_v1 = vpack.c.bf16 %v83_v0, %v64_v63  ;;  %v70_v63 = vld [vmem:[%s3248_s0 + $0x88] sm:$0xff]  ;;  %v89_v0 = vld [vmem:[%s3248_s0 + $0x120] sm:$0xff] }
  0x49   :  { %2415 = vmatprep.subr.bf16.mxu0 %v2748_v4  ;;  %v82_v4 = vld [vmem:[%s3248_s0 + $0xe8] sm:$0xff] }
  0x4a   :  { %2436 = vmatpush3.bf16.msra.mxu1 %v2747_v3  ;;  %v63_v3 = vld [vmem:[%s3248_s0 + $0x50] sm:$0xff] }
  0x4b   :  { %2437 = vmatprep.subr.bf16.mxu1 %v2750_v6  ;;  %v2790_v6 = vld [vmem:[#allocation2 + $0x3c0] sm:$0xff]  }
  0x4c   :  { %2416 = vmatpush3.bf16.msra.mxu0 %v2749_v5  ;;  %v101_v5 = vpack.c.bf16 %v82_v4, %v63_v3  ;;  %v2838_v3 = vld [vmem:[#allocation2 + $0x490] sm:$0xff]  }
  0x4d   :  { %2417 = vmatprep.subr.bf16.mxu0 %v2752_v8  ;;  %v2792_v8 = vld [vmem:[#allocation2 + $0x348] sm:$0xff]   ;;  %v2834_v4 = vld [vmem:[#allocation2 + $0x430] sm:$0xff]  }
  0x4e   :  { %2438 = vmatpush3.bf16.msra.mxu1 %v2751_v7  ;;  %v2791_v7 = vld [vmem:[#allocation2 + $0x380] sm:$0xff]  }
  0x4f   :  { %2439 = vmatprep.subr.bf16.mxu1 %v2754_v10  ;;  %v2794_v10 = vld [vmem:[#allocation2 + $0x3c8] sm:$0xff]  }
  0x50   :  { %2418 = vmatpush3.bf16.msra.mxu0 %v2753_v9  ;;  %v2793_v9 = vld [vmem:[#allocation2 + $0x308] sm:$0xff]  }
  0x51   :  { %2447 = vmatprep.subr.bf16.mxu0 %v2756_v18  ;;  %v2802_v18 = vld [vmem:[#allocation2 + $0x3d8] sm:$0xff]  }
  0x52   :  { %2440 = vmatpush3.bf16.msra.mxu1 %v2755_v14  ;;  %v2798_v14 = vld [vmem:[#allocation2 + $0x3d0] sm:$0xff]  }
  0x53   :  { %1412 = vmatmul.mubr.bf16.vlgmr.msra.gmra.mrb[4].mxu0 %v95_v17  ;;  %2469 = vmatprep.subr.bf16.mxu1 %v2758_v26  ;;  %v2801_v17 = vld [vmem:[#allocation2 + $0x318] sm:$0xff]   ;;  %v2810_v26 = vld [vmem:[#allocation2 + $0x3e8] sm:$0xff]  }
  0x54   :  { %2448 = vmatpush3.bf16.msra.mxu0 %v2757_v22  ;;  %1493 = vmatprep.mubr.bf16.mxu0 %v100_v57  ;;  %v2806_v22 = vld [vmem:[#allocation2 + $0x3e0] sm:$0xff]  }
  0x55   :  { %1453 = vmatmul.mubr.bf16.vlgmr.msra.gmra.mrb[4].mxu1 %v97_v25  ;;  %2449 = vmatprep.subr.bf16.mxu0 %v2760_v28  ;;  %v2809_v25 = vld [vmem:[#allocation2 + $0x328] sm:$0xff]   ;;  %v2812_v28 = vld [vmem:[#allocation2 + $0x370] sm:$0xff]   ;;  %v2828_v57 = vld [vmem:[#allocation2 + $0x460] sm:$0xff]  }
  0x56   :  { %2470 = vmatpush3.bf16.msra.mxu1 %v2759_v27  ;;  %1534 = vmatprep.mubr.bf16.mxu1 %v102_v1  ;;  %v2811_v27 = vld [vmem:[#allocation2 + $0x3a8] sm:$0xff]   ;;  %v2833_v1 = vld [vmem:[#allocation2 + $0x470] sm:$0xff]  }
  0x57   :  { %2471 = vmatprep.subr.bf16.mxu1 %v2762_v30  ;;  %v2814_v30 = vld [vmem:[#allocation2 + $0x3f0] sm:$0xff]  }
  0x58   :  { %2450 = vmatpush3.bf16.msra.mxu0 %v2761_v29  ;;  %v2813_v29 = vld [vmem:[#allocation2 + $0x330] sm:$0xff]  }
  0x59   :  { %2451 = vmatprep.subr.bf16.mxu0 %v2764_v32  ;;  %v2816_v32 = vld [vmem:[#allocation2 + $0x378] sm:$0xff]  }
  0x5a   :  { %2472 = vmatpush3.bf16.msra.mxu1 %v2763_v31  ;;  %v2815_v31 = vld [vmem:[#allocation2 + $0x3b0] sm:$0xff]  }
  0x5b   :  { %2473 = vmatprep.subr.bf16.mxu1 %v2766_v34  ;;  %v2818_v34 = vld [vmem:[#allocation2 + $0x3f8] sm:$0xff]  }
  0x5c   :  { %2452 = vmatpush3.bf16.msra.mxu0 %v2765_v33  ;;  %v2817_v33 = vld [vmem:[#allocation2 + $0x338] sm:$0xff]  }
  0x5d   :  { %2453 = vmatprep.subr.bf16.mxu0 %v2768_v36  ;;  %v85_v36 = vld [vmem:[%s3248_s0 + $0x100] sm:$0xff] }
  0x5e   :  { %2474 = vmatpush3.bf16.msra.mxu1 %v2767_v35  ;;  %v66_v35 = vld [vmem:[%s3248_s0 + $0x68] sm:$0xff] }
  0x5f   :  { %2475 = vmatprep.subr.bf16.mxu1 %v2770_v38  ;;  %v2819_v38 = vld [vmem:[#allocation2 + $0x3b8] sm:$0xff]  }
  0x60   :  { %2454 = vmatpush3.bf16.msra.mxu0 %v2769_v37  ;;  %v104_v37 = vpack.c.bf16 %v85_v36, %v66_v35  ;;  %v2844_v35 = vld [vmem:[%s3251_s3 + $0x28] sm:$0xff]   ;;  %v2845_v36 = vld [vmem:[%s3251_s3 + $0x30] sm:$0xff]  }
  0x61   :  { %2455 = vmatprep.subr.bf16.mxu0 %v2772_v40  ;;  %v84_v40 = vld [vmem:[%s3248_s0 + $0xf8] sm:$0xff] }
  0x62   :  { %2476 = vmatpush3.bf16.msra.mxu1 %v2771_v39  ;;  %v65_v39 = vld [vmem:[%s3248_s0 + $0x60] sm:$0xff] }
  0x63   :  { %2477 = vmatprep.subr.bf16.mxu1 %v2774_v42  ;;  %v2820_v42 = vld [vmem:[#allocation2 + $0x440] sm:$0xff]  }
  0x64   :  { %2456 = vmatpush3.bf16.msra.mxu0 %v2773_v41  ;;  %v103_v41 = vpack.c.bf16 %v84_v40, %v65_v39  ;;  %v2848_v39 = vld [vmem:[%s3253_s5 + $0x8] sm:$0xff]   ;;  %v2849_v40 = vld [vmem:[%s3253_s5 + $0x10] sm:$0xff]  }
  0x65   :  { %2457 = vmatprep.subr.bf16.mxu0 %v2776_v44  ;;  %v87_v44 = vld [vmem:[%s3248_s0 + $0x110] sm:$0xff] }
  0x66   :  { %2478 = vmatpush3.bf16.msra.mxu1 %v2775_v43  ;;  %v68_v43 = vld [vmem:[%s3248_s0 + $0x78] sm:$0xff] }
  0x67   :  { %2479 = vmatprep.subr.bf16.mxu1 %v2778_v46  ;;  %v2821_v46 = vld [vmem:[#allocation2 + $0x400] sm:$0xff]  }
  0x68   :  { %2458 = vmatpush3.bf16.msra.mxu0 %v2777_v45  ;;  %v106_v45 = vpack.c.bf16 %v87_v44, %v68_v43 }
  0x69   :  { %2459 = vmatprep.subr.bf16.mxu0 %v2780_v48  ;;  %v67_v48 = vld [vmem:[%s3248_s0 + $0x70] sm:$0xff] }
  0x6a   :  { %2480 = vmatpush3.bf16.msra.mxu1 %v2779_v47  ;;  %v2898_v47 = vmov 0.0  }
  0x6b   :  { %2481 = vmatprep.subr.bf16.mxu1 %v2782_v50 }
  0x6c   :  { %2460 = vmatpush3.bf16.msra.mxu0 %v2781_v49  ;;  %v86_v49 = vld [vmem:[%s3248_s0 + $0x108] sm:$0xff] }
  0x6d   :  { %2461 = vmatprep.subr.bf16.mxu0 %v2784_v52  ;;  %v105_v50 = vpack.c.bf16 %v86_v49, %v67_v48  ;;  %v2823_v52 = vld [vmem:[#allocation2 + $0x408] sm:$0xff]  }
  0x6e   :  { %2482 = vmatpush3.bf16.msra.mxu1 %v2783_v51  ;;  %v2822_v51 = vld [vmem:[#allocation2 + $0x448] sm:$0xff]  }
  0x6f   :  { %2483 = vmatprep.subr.bf16.mxu1 %v2786_v54  ;;  %v2825_v54 = vld [vmem:[#allocation2 + $0x410] sm:$0xff]  }
  0x70   :  { %2462 = vmatpush3.bf16.msra.mxu0 %v2785_v53  ;;  %v2824_v53 = vld [vmem:[#allocation2 + $0x450] sm:$0xff]  }
  0x71   :  { %2491 = vmatprep.subr.bf16.mxu0 %v2788_v62  ;;  %v2831_v62 = vld [vmem:[#allocation2 + $0x428] sm:$0xff]  }
  0x72   :  { %2484 = vmatpush3.bf16.msra.mxu1 %v2787_v58  ;;  %v2832_v58 = vld [vmem:[#allocation2 + $0x480] sm:$0xff]  }
  0x73   :  { %1494 = vmatmul.mubr.bf16.vlgmr.msra.gmra.mrb[8].mxu0 %v99_v61  ;;  %2513 = vmatprep.subr.bf16.mxu1 %v2790_v6  ;;  %v2835_v61 = vld [vmem:[#allocation2 + $0x488] sm:$0xff]  }
  0x74   :  { %2492 = vmatpush3.bf16.msra.mxu0 %v2789_v2  ;;  %1575 = vmatprep.mubr.bf16.mxu0 %v104_v37  ;;  %v108_v2 = vpack.c.bf16 %v89_v0, %v70_v63  ;;  %v90_v6 = vld [vmem:[%s3248_s0 + $0x128] sm:$0xff]  ;;  %v2846_v37 = vld [vmem:[%s3251_s3 + $0x38] sm:$0xff]  }
  0x75   :  { %1535 = vmatmul.mubr.bf16.vlgmr.msra.gmra.mrb[8].mxu1 %v101_v5  ;;  %2493 = vmatprep.subr.bf16.mxu0 %v2792_v8  ;;  %v71_v5 = vld [vmem:[%s3248_s0 + $0x90] sm:$0xff] }
  0x76   :  { %2514 = vmatpush3.bf16.msra.mxu1 %v2791_v7  ;;  %1616 = vmatprep.mubr.bf16.mxu1 %v106_v45  ;;  %v2836_v7 = vld [vmem:[#allocation2 + $0x478] sm:$0xff]   ;;  %v109_v8 = vpack.c.bf16 %v90_v6, %v71_v5 }
  0x77   :  { %2515 = vmatprep.subr.bf16.mxu1 %v2794_v10  ;;  %v69_v10 = vld [vmem:[%s3248_s0 + $0x80] sm:$0xff] }
  0x78   :  { %2494 = vmatpush3.bf16.msra.mxu0 %v2793_v9  ;;  %v2837_v9 = vld [vmem:[#allocation2 + $0x438] sm:$0xff]  }
  0x79   :  { %2495 = vmatprep.subr.bf16.mxu0 %v2796_v12 }
  0x7a   :  { %2516 = vmatpush3.bf16.msra.mxu1 %v2795_v11  ;;  %v88_v11 = vld [vmem:[%s3248_s0 + $0x118] sm:$0xff] }
  0x7b   :  { %2517 = vmatprep.subr.bf16.mxu1 %v2798_v14  ;;  %v107_v12 = vpack.c.bf16 %v88_v11, %v69_v10  ;;  %v2840_v14 = vld [vmem:[%s3251_s3 + $0x8] sm:$0xff]  }
  0x7c   :  { %2496 = vmatpush3.bf16.msra.mxu0 %v2797_v13  ;;  %v2839_v13 = vld [vmem:[%s3251_s3] sm:$0xff]  }
  0x7d   :  { %2497 = vmatprep.subr.bf16.mxu0 %v2800_v16  ;;  %v2842_v16 = vld [vmem:[%s3251_s3 + $0x18] sm:$0xff]  }
  0x7e   :  { %2518 = vmatpush3.bf16.msra.mxu1 %v2799_v15  ;;  %v2841_v15 = vld [vmem:[%s3251_s3 + $0x10] sm:$0xff]  }
  0x7f   :  { %2519 = vmatprep.subr.bf16.mxu1 %v2802_v18 }
  0x80   :  { %2498 = vmatpush3.bf16.msra.mxu0 %v2801_v17  ;;  %v2843_v17 = vld [vmem:[%s3251_s3 + $0x20] sm:$0xff]  }
  0x81   :  { %2499 = vmatprep.subr.bf16.mxu0 %v2804_v20 }
  0x82   :  { %2520 = vmatpush3.bf16.msra.mxu1 %v2803_v19  ;;  %v2174_v19 = vld [vmem:[%s3250_s2] ss:$0 sm:$0xff] }
  0x83   :  { %2521 = vmatprep.subr.bf16.mxu1 %v2806_v22 }
  0x84   :  { %2500 = vmatpush3.bf16.msra.mxu0 %v2805_v21 }
  0x85   :  { %2501 = vmatprep.subr.bf16.mxu0 %v2808_v24 }
  0x86   :  { %2522 = vmatpush3.bf16.msra.mxu1 %v2807_v23 }
  0x87   :  { %2523 = vmatprep.subr.bf16.mxu1 %v2810_v26 }
  0x88   :  { %2502 = vmatpush3.bf16.msra.mxu0 %v2809_v25 }
  0x89   :  { %2503 = vmatprep.subr.bf16.mxu0 %v2812_v28 }
  0x8a   :  { %2524 = vmatpush3.bf16.msra.mxu1 %v2811_v27 }
  0x8b   :  { %2525 = vmatprep.subr.bf16.mxu1 %v2814_v30 }
  0x8c   :  { %2504 = vmatpush3.bf16.msra.mxu0 %v2813_v29 }
  0x8d   :  { %2505 = vmatprep.subr.bf16.mxu0 %v2816_v32 }
  0x8e   :  { %2526 = vmatpush3.bf16.msra.mxu1 %v2815_v31 }
  0x8f   :  { %2527 = vmatprep.subr.bf16.mxu1 %v2818_v34 }
  0x90   :  { %2506 = vmatpush3.bf16.msra.mxu0 %v2817_v33 }
  0x91   :  { %2535 = vmatprep.subr.bf16.mxu0 %v2820_v42 }
  0x92   :  { %2528 = vmatpush3.bf16.msra.mxu1 %v2819_v38  ;;  %v2847_v38 = vld [vmem:[%s3253_s5] sm:$0xff]  }
  0x93   :  { %2597 = vmatprep.subr.bf16.mxu1 %v2898_v47  ;;  %1576 = vmatmul.mubr.bf16.vlgmr.msra.gmra.mrb[12].mxu0 %v103_v41  ;;  %v2850_v41 = vld [vmem:[%s3253_s5 + $0x18] sm:$0xff]  }
  0x94   :  { %2536 = vmatpush3.bf16.msra.mxu0 %v2821_v46  ;;  %1657 = vmatprep.mubr.bf16.mxu0 %v108_v2  ;;  %v2851_v46 = vld [vmem:[%s3253_s5 + $0x20] sm:$0xff]  }
  0x95   :  { %1617 = vmatmul.mubr.bf16.vlgmr.msra.gmra.mrb[12].mxu1 %v105_v50  ;;  %2537 = vmatprep.subr.bf16.mxu0 %v2822_v51 }
  0x96   :  { %2603 = vmatprep.mubr.msk.bf16.mxu1 %vm2899_vm0, %v2898_v47  ;;  %2598 = vmatpush3.bf16.msra.mxu1 %v2832_v58 }
  0x97   :  { %2599 = vmatprep.subr.bf16.mxu1 %v2898_v47 }
  0x98   :  { %2538 = vmatpush3.bf16.msra.mxu0 %v2823_v52 }
  0x99   :  { %2539 = vmatprep.subr.bf16.mxu0 %v2824_v53 }
  0x9a   :  { %2600 = vmatpush3.bf16.msra.mxu1 %v2835_v61 }
  0x9b   :  { %2601 = vmatprep.subr.bf16.mxu1 %v2898_v47 }
  0x9c   :  { %2540 = vmatpush3.bf16.msra.mxu0 %v2825_v54 }
  0x9d   :  { %2541 = vmatprep.subr.bf16.mxu0 %v2826_v55 }
  0x9e   :  { %2602 = vmatpush3.bf16.msra.mxu1 %v2838_v3 }
  0x9f   :  { %2607 = vmatprep.subr.bf16.mxu1 %v2898_v47 }
  0xa0   :  { %2542 = vmatpush3.bf16.msra.mxu0 %v2827_v56  ;;  %v2852_v56 = vld [vmem:[%s3253_s5 + $0x28] sm:$0xff]  }
  0xa1   :  { %2543 = vmatprep.subr.bf16.mxu0 %v2828_v57  ;;  %2604 = vmatmul.mubr.msk.bf16.vlgmr.msra.gmra.mrb[16].mxu1 %vm1293_vm1, %v109_v8 }
  0xa2   :  { %2623 = vmatprep.mubr.msk.bf16.mxu1 %vm2899_vm0, %v2898_v47  ;;  %2608 = vmatpush3.bf16.msra.mxu1 %v2839_v13 }
  0xa3   :  { %2609 = vmatprep.subr.bf16.mxu1 %v2898_v47 }
  0xa4   :  { %2544 = vmatpush3.bf16.msra.mxu0 %v2829_v59 }
  0xa5   :  { %2545 = vmatprep.subr.bf16.mxu0 %v2830_v60 }
  0xa6   :  { %2610 = vmatpush3.bf16.msra.mxu1 %v2840_v14 }
  0xa7   :  { %2611 = vmatprep.subr.bf16.mxu1 %v2898_v47 }
  0xa8   :  { %2546 = vmatpush3.bf16.msra.mxu0 %v2831_v62 }
  0xa9   :  { %2547 = vmatprep.subr.bf16.mxu0 %v2833_v1 }
  0xaa   :  { %2612 = vmatpush3.bf16.msra.mxu1 %v2841_v15 }
  0xab   :  { %2613 = vmatprep.subr.bf16.mxu1 %v2898_v47 }
  0xac   :  { %2548 = vmatpush3.bf16.msra.mxu0 %v2834_v4 }
  0xad   :  { %2549 = vmatprep.subr.bf16.mxu0 %v2836_v7 }
  0xae   :  { %2614 = vmatpush3.bf16.msra.mxu1 %v2842_v16 }
  0xaf   :  { %2615 = vmatprep.subr.bf16.mxu1 %v2898_v47 }
  0xb0   :  { %2550 = vmatpush3.bf16.msra.mxu0 %v2837_v9 }
  0xb1   :  { %2627 = vmatprep.subr.bf16.mxu0 %v2898_v47 }
  0xb2   :  { %2616 = vmatpush3.bf16.msra.mxu1 %v2843_v17 }
  0xb3   :  { %1658 = vmatmul.mubr.bf16.vlgmr.msra.gmra.mrb[16].mxu0 %v107_v12  ;;  %2617 = vmatprep.subr.bf16.mxu1 %v2898_v47 }
  0xb4   :  { %2643 = vmatprep.mubr.msk.bf16.mxu0 %vm2899_vm0, %v2898_v47  ;;  %2628 = vmatpush3.bf16.msra.mxu0 %v2847_v38 }
  0xb5   :  { %2629 = vmatprep.subr.bf16.mxu0 %v2898_v47 }
  0xb6   :  { %2618 = vmatpush3.bf16.msra.mxu1 %v2844_v35 }
  0xb7   :  { %2619 = vmatprep.subr.bf16.mxu1 %v2898_v47 }
  0xb8   :  { %2630 = vmatpush3.bf16.msra.mxu0 %v2848_v39 }
  0xb9   :  { %2631 = vmatprep.subr.bf16.mxu0 %v2898_v47 }
  0xba   :  { %2620 = vmatpush3.bf16.msra.mxu1 %v2845_v36 }
  0xbb   :  { %2621 = vmatprep.subr.bf16.mxu1 %v2898_v47 }
  0xbc   :  { %2632 = vmatpush3.bf16.msra.mxu0 %v2849_v40 }
  0xbd   :  { %2633 = vmatprep.subr.bf16.mxu0 %v2898_v47 }
  0xbe   :  { %2622 = vmatpush3.bf16.msra.mxu1 %v2846_v37 }
  0xbf   :  { %2647 = vmatprep.subr.bf16.mxu1 %v2898_v47 }
  0xc0   :  { %2634 = vmatpush3.bf16.msra.mxu0 %v2850_v41 }
  0xc1   :  { %2635 = vmatprep.subr.bf16.mxu0 %v2898_v47 }
  0xc4   :  { %2636 = vmatpush3.bf16.msra.mxu0 %v2851_v46  ;;  %v2853_v46 = vld [vmem:[%s3253_s5 + $0x30] sm:$0xff]  }
  0xc5   :  { %2637 = vmatprep.subr.bf16.mxu0 %v2898_v47 }
  0xc8   :  { %2638 = vmatpush3.bf16.msra.mxu0 %v2852_v56 }
  0xc9   :  { %2639 = vmatprep.subr.bf16.mxu0 %v2898_v47 }
  0xcc   :  { %2640 = vmatpush3.bf16.msra.mxu0 %v2853_v46 }
  0xcd   :  { %2641 = vmatprep.subr.bf16.mxu0 %v2898_v47 }
 0x106   :  { %v2375_v18 = vpop.f32.mrb[0].mxu0 }
 0x107   :  { %v2376_v20 = vpop.f32.mrb[1].mxu0 }
 0x108   :  { %v2377_v21 = vadd.f32 %v2376_v20, %v2375_v18  ;;  %v2378_v22 = vpop.f32.mrb[2].mxu0  ;;  %v2397_v23 = vpop.f32.mrb[0].mxu1 }
 0x109   :  { %v2379_v24 = vpop.f32.mrb[3].mxu0  ;;  %v2398_v27 = vpop.f32.mrb[1].mxu1 }
 0x10a   :  { %v1332_v25 = vadd.f32 %v2377_v21, %v2174_v19  ;;  %v2380_v26 = vadd.f32 %v2379_v24, %v2378_v22  ;;  %v2399_v28 = vadd.f32 %v2398_v27, %v2397_v23  ;;  %v2400_v29 = vpop.f32.mrb[2].mxu1 }
 0x10b   :  { %v2401_v31 = vpop.f32.mrb[3].mxu1 }
 0x10c   :  { %v1335_v30 = vadd.f32 %v2380_v26, %v2174_v19  ;;  %v1373_v32 = vadd.f32 %v2399_v28, %v1332_v25  ;;  %v2402_v33 = vadd.f32 %v2401_v31, %v2400_v29 }
 0x10e   :  { %v1376_v34 = vadd.f32 %v2402_v33, %v1335_v30 }
 0x126   :  { %v2419_v42 = vpop.f32.mrb[4].mxu0 }
 0x127   :  { %v2420_v43 = vpop.f32.mrb[5].mxu0 }
 0x128   :  { %v2421_v44 = vadd.f32 %v2420_v43, %v2419_v42  ;;  %v2422_v45 = vpop.f32.mrb[6].mxu0  ;;  %v2441_v50 = vpop.f32.mrb[4].mxu1 }
 0x129   :  { %v2423_v48 = vpop.f32.mrb[7].mxu0  ;;  %v2442_v52 = vpop.f32.mrb[5].mxu1 }
 0x12a   :  { %v1414_v49 = vadd.f32 %v2421_v44, %v1373_v32  ;;  %v2424_v51 = vadd.f32 %v2423_v48, %v2422_v45  ;;  %v2443_v54 = vadd.f32 %v2442_v52, %v2441_v50  ;;  %v2444_v55 = vpop.f32.mrb[6].mxu1  ;;  %v2854_v48 = vld [vmem:[%s3253_s5 + $0x38] sm:$0xff]   ;;  %v2856_v50 = vld [vmem:[%s3255_s7 + $0x8] sm:$0xff]  }
 0x12b   :  { %v2445_v57 = vpop.f32.mrb[7].mxu1  ;;  %2642 = vmatpush3.bf16.msra.mxu0 %v2854_v48  ;;  %v2858_v52 = vld [vmem:[%s3255_s7 + $0x18] sm:$0xff]  }
 0x12c   :  { %v1417_v53 = vadd.f32 %v2424_v51, %v1376_v34  ;;  %v1455_v58 = vadd.f32 %v2443_v54, %v1414_v49  ;;  %v2446_v59 = vadd.f32 %v2445_v57, %v2444_v55  ;;  %2667 = vmatprep.subr.bf16.mxu0 %v2898_v47  ;;  %v2855_v49 = vld [vmem:[%s3255_s7] sm:$0xff]   ;;  %v2857_v51 = vld [vmem:[%s3255_s7 + $0x10] sm:$0xff]   ;;  %v2860_v54 = vld [vmem:[%s3255_s7 + $0x28] sm:$0xff]  }
 0x12d   :  { %v2323_v55 = vld [vmem:[%s3252_s4] ss:$0 sm:$0xff] }
 0x12e   :  { %v1458_v60 = vadd.f32 %v2446_v59, %v1417_v53  ;;  %v2859_v53 = vld [vmem:[%s3255_s7 + $0x20] sm:$0xff]  }
 0x146   :  { %v2463_v61 = vpop.f32.mrb[8].mxu0 }
 0x147   :  { %v2464_v62 = vpop.f32.mrb[9].mxu0 }
 0x148   :  { %v2465_v63 = vadd.f32 %v2464_v62, %v2463_v61  ;;  %v2466_v0 = vpop.f32.mrb[10].mxu0  ;;  %v2485_v1 = vpop.f32.mrb[8].mxu1 }
 0x149   :  { %v2467_v2 = vpop.f32.mrb[11].mxu0  ;;  %v2486_v5 = vpop.f32.mrb[9].mxu1 }
 0x14a   :  { %v1496_v3 = vadd.f32 %v2465_v63, %v1455_v58  ;;  %v2468_v4 = vadd.f32 %v2467_v2, %v2466_v0  ;;  %v2487_v6 = vadd.f32 %v2486_v5, %v2485_v1  ;;  %v2488_v7 = vpop.f32.mrb[10].mxu1  ;;  %v2861_v1 = vld [vmem:[%s3255_s7 + $0x30] sm:$0xff]   ;;  %v2862_v2 = vld [vmem:[%s3255_s7 + $0x38] sm:$0xff]  }
 0x14b   :  { %v2489_v9 = vpop.f32.mrb[11].mxu1  ;;  %v2865_v5 = vld [vmem:[%s3257_s9 + $0x10] sm:$0xff]  }
 0x14c   :  { %v1499_v8 = vadd.f32 %v2468_v4, %v1458_v60  ;;  %v1537_v10 = vadd.f32 %v2487_v6, %v1496_v3  ;;  %v2490_v11 = vadd.f32 %v2489_v9, %v2488_v7  ;;  %v2863_v3 = vld [vmem:[%s3257_s9] sm:$0xff]   ;;  %v2864_v4 = vld [vmem:[%s3257_s9 + $0x8] sm:$0xff]   ;;  %v2866_v6 = vld [vmem:[%s3257_s9 + $0x18] sm:$0xff]  }
 0x14d   :  { %v2867_v7 = vld [vmem:[%s3257_s9 + $0x20] sm:$0xff]  }
 0x14e   :  { %v1540_v12 = vadd.f32 %v2490_v11, %v1499_v8  ;;  %v2868_v8 = vld [vmem:[%s3257_s9 + $0x28] sm:$0xff]   ;;  %v2332_v9 = vld [vmem:[%s3254_s6] ss:$0 sm:$0xff] }
 0x166   :  { %v2507_v13 = vpop.f32.mrb[12].mxu0 }
 0x167   :  { %v2508_v14 = vpop.f32.mrb[13].mxu0 }
 0x168   :  { %v2509_v15 = vadd.f32 %v2508_v14, %v2507_v13  ;;  %v2510_v16 = vpop.f32.mrb[14].mxu0  ;;  %v2529_v17 = vpop.f32.mrb[12].mxu1 }
 0x169   :  { %v2511_v18 = vpop.f32.mrb[15].mxu0  ;;  %v2530_v21 = vpop.f32.mrb[13].mxu1 }
 0x16a   :  { %v1578_v19 = vadd.f32 %v2509_v15, %v1537_v10  ;;  %v2512_v20 = vadd.f32 %v2511_v18, %v2510_v16  ;;  %v2531_v22 = vadd.f32 %v2530_v21, %v2529_v17  ;;  %v2532_v23 = vpop.f32.mrb[14].mxu1  ;;  %v2341_v21 = vld [vmem:[%s3256_s8] ss:$0 sm:$0xff] }
 0x16b   :  { %v2533_v25 = vpop.f32.mrb[15].mxu1 }
 0x16c   :  { %v1581_v24 = vadd.f32 %v2512_v20, %v1540_v12  ;;  %v1619_v26 = vadd.f32 %v2531_v22, %v1578_v19  ;;  %v2534_v27 = vadd.f32 %v2533_v25, %v2532_v23  ;;  %v2869_v19 = vld [vmem:[%s3257_s9 + $0x30] sm:$0xff]   ;;  %v2870_v20 = vld [vmem:[%s3257_s9 + $0x38] sm:$0xff]  }
 0x16e   :  { %v1622_v28 = vadd.f32 %v2534_v27, %v1581_v24 }
 0x174   :  { %v1700_v29 = vpop.f32.mrb[16].mxu1 }
 0x175   :  { %v2605_v30 = vpop.f32.mrb[17].mxu1 }
 0x176   :  { %v1703_v31 = vpop.f32.mrb[18].mxu1 }
 0x177   :  { %v2606_v32 = vpop.f32.mrb[19].mxu1 }
 0x186   :  { %v2551_v33 = vpop.f32.mrb[16].mxu0 }
 0x187   :  { %v2552_v34 = vpop.f32.mrb[17].mxu0 }
 0x188   :  { %v2553_v35 = vadd.f32 %v2552_v34, %v2551_v33  ;;  %v2554_v36 = vpop.f32.mrb[18].mxu0 }
 0x189   :  { %v2555_v37 = vpop.f32.mrb[19].mxu0 }
 0x18a   :  { %v1660_v38 = vadd.f32 %v2553_v35, %v1619_v26  ;;  %v2556_v39 = vadd.f32 %v2555_v37, %v2554_v36 }
 0x18c   :  { %v1701_v40 = vadd.f32 %v1700_v29, %v1660_v38  ;;  %v1663_v41 = vadd.f32 %v2556_v39, %v1622_v28 }
 0x18e   :  { %v1704_v42 = vadd.f32 %v1703_v31, %v1663_v41  ;;  %v1707_v43 = vmax.f32 %v1701_v40, 0.0 }
 0x190   :  { %v1708_v44 = vmax.f32 %v1704_v42, 0.0 }
 0x192   :  { %v1709_v45 = vpack.c.bf16 %v1708_v44, %v1707_v43 }
 0x194   :  { %2624 = vmatmul.mubr.bf16.vlgmr.msra.gmra.mrb[20].mxu1 %v1709_v45 }
 0x195   :  { %2663 = vmatprep.mubr.msk.bf16.mxu1 %vm2899_vm0, %v2898_v47  ;;  %2648 = vmatpush3.bf16.msra.mxu1 %v2855_v49 }
 0x196   :  { %2649 = vmatprep.subr.bf16.mxu1 %v2898_v47 }
 0x199   :  { %2650 = vmatpush3.bf16.msra.mxu1 %v2856_v50 }
 0x19a   :  { %2651 = vmatprep.subr.bf16.mxu1 %v2898_v47 }
 0x19d   :  { %2652 = vmatpush3.bf16.msra.mxu1 %v2857_v51 }
 0x19e   :  { %2653 = vmatprep.subr.bf16.mxu1 %v2898_v47 }
 0x1a1   :  { %2654 = vmatpush3.bf16.msra.mxu1 %v2858_v52 }
 0x1a2   :  { %2655 = vmatprep.subr.bf16.mxu1 %v2898_v47 }
 0x1a5   :  { %2656 = vmatpush3.bf16.msra.mxu1 %v2859_v53 }
 0x1a6   :  { %2657 = vmatprep.subr.bf16.mxu1 %v2898_v47 }
 0x1a9   :  { %2658 = vmatpush3.bf16.msra.mxu1 %v2860_v54 }
 0x1aa   :  { %2659 = vmatprep.subr.bf16.mxu1 %v2898_v47 }
 0x1ad   :  { %2660 = vmatpush3.bf16.msra.mxu1 %v2861_v1 }
 0x1ae   :  { %2661 = vmatprep.subr.bf16.mxu1 %v2898_v47 }
 0x1b1   :  { %2662 = vmatpush3.bf16.msra.mxu1 %v2862_v2 }
 0x267   :  { %v1815_v56 = vpop.f32.mrb[20].mxu1 }
 0x268   :  { %v1816_v57 = vadd.f32 %v2323_v55, %v1815_v56  ;;  %v2625_v58 = vpop.f32.mrb[21].mxu1 }
 0x269   :  { %v1818_v59 = vpop.f32.mrb[22].mxu1 }
 0x26a   :  { %v1819_v60 = vadd.f32 %v2323_v55, %v1818_v59  ;;  %v2626_v61 = vpop.f32.mrb[23].mxu1  ;;  %v1822_v62 = vmax.f32 %v1816_v57, 0.0 }
 0x26c   :  { %v1823_v63 = vmax.f32 %v1819_v60, 0.0 }
 0x26e   :  { %v1824_v0 = vpack.c.bf16 %v1823_v63, %v1822_v62 }
 0x270   :  { %2644 = vmatmul.mubr.bf16.vlgmr.msra.gmra.mrb[20].mxu0 %v1824_v0 }
 0x271   :  { %2683 = vmatprep.mubr.msk.bf16.mxu0 %vm2899_vm0, %v2898_v47  ;;  %2668 = vmatpush3.bf16.msra.mxu0 %v2863_v3 }
 0x272   :  { %2669 = vmatprep.subr.bf16.mxu0 %v2898_v47 }
 0x275   :  { %2670 = vmatpush3.bf16.msra.mxu0 %v2864_v4 }
 0x276   :  { %2671 = vmatprep.subr.bf16.mxu0 %v2898_v47 }
 0x279   :  { %2672 = vmatpush3.bf16.msra.mxu0 %v2865_v5 }
 0x27a   :  { %2673 = vmatprep.subr.bf16.mxu0 %v2898_v47 }
 0x27d   :  { %2674 = vmatpush3.bf16.msra.mxu0 %v2866_v6 }
 0x27e   :  { %2675 = vmatprep.subr.bf16.mxu0 %v2898_v47 }
 0x281   :  { %2676 = vmatpush3.bf16.msra.mxu0 %v2867_v7 }
 0x282   :  { %2677 = vmatprep.subr.bf16.mxu0 %v2898_v47 }
 0x285   :  { %2678 = vmatpush3.bf16.msra.mxu0 %v2868_v8 }
 0x286   :  { %2679 = vmatprep.subr.bf16.mxu0 %v2898_v47 }
 0x289   :  { %2680 = vmatpush3.bf16.msra.mxu0 %v2869_v19 }
 0x28a   :  { %2681 = vmatprep.subr.bf16.mxu0 %v2898_v47  ;;  %v2350_v47 = vld [vmem:[%s3258_s10] ss:$0 sm:$0xff] }
 0x28d   :  { %2682 = vmatpush3.bf16.msra.mxu0 %v2870_v20 }
 0x343   :  { %v1930_v10 = vpop.f32.mrb[20].mxu0 }
 0x344   :  { %v1931_v11 = vadd.f32 %v2332_v9, %v1930_v10  ;;  %v2645_v12 = vpop.f32.mrb[21].mxu0 }
 0x345   :  { %v1933_v13 = vpop.f32.mrb[22].mxu0 }
 0x346   :  { %v1934_v14 = vadd.f32 %v2332_v9, %v1933_v13  ;;  %v2646_v15 = vpop.f32.mrb[23].mxu0  ;;  %v1937_v16 = vmax.f32 %v1931_v11, 0.0 }
 0x348   :  { %v1938_v17 = vmax.f32 %v1934_v14, 0.0 }
 0x34a   :  { %v1939_v18 = vpack.c.bf16 %v1938_v17, %v1937_v16 }
 0x34c   :  { %2664 = vmatmul.mubr.bf16.vlgmr.msra.gmra.mrb[24].mxu1 %v1939_v18 }
 0x41f   :  { %v2045_v22 = vpop.f32.mrb[24].mxu1 }
 0x420   :  { %v2046_v23 = vadd.f32 %v2341_v21, %v2045_v22  ;;  %v2665_v24 = vpop.f32.mrb[25].mxu1 }
 0x421   :  { %v2048_v25 = vpop.f32.mrb[26].mxu1 }
 0x422   :  { %v2049_v26 = vadd.f32 %v2341_v21, %v2048_v25  ;;  %v2666_v27 = vpop.f32.mrb[27].mxu1  ;;  %v2052_v28 = vmax.f32 %v2046_v23, 0.0 }
 0x424   :  { %v2053_v29 = vmax.f32 %v2049_v26, 0.0 }
 0x426   :  { %v2054_v30 = vpack.c.bf16 %v2053_v29, %v2052_v28 }
 0x428   :  { %2684 = vmatmul.mubr.bf16.vlgmr.msra.gmra.mrb[24].mxu0 %v2054_v30 }
 0x4fb   :  { %v2160_v31 = vpop.f32.mrb[24].mxu0 }
 0x4fc   :  { %v2161_v32 = vadd.f32 %v2350_v47, %v2160_v31  ;;  %v2685_v33 = vpop.f32.mrb[25].mxu0 }
 0x4fd   :  { %v2163_v34 = vpop.f32.mrb[26].mxu0 }
 0x4fe   :  { %2167 = vst [vmem:[%s3259_s11] sm:$0xff] %v2161_v32  ;;  %v2164_v35 = vadd.f32 %v2350_v47, %v2163_v34  ;;  %v2686_v36 = vpop.f32.mrb[27].mxu0 }
 0x500   :  { %2168 = vst [vmem:[%s3259_s11 + $0x8] sm:$0xff] %v2164_v35 }
 0x501   :  { %2173 = vsyncpa [#allocation3], 1 }

</bundles_post_ra>
